<compile_context>
chip_gen: v7x
topology: tpu7x:2x2x1
jax: 0.10.0
libtpu: 0.0.40
codegen_flags: <defaults>
</compile_context>

<pallas_src>
import math

import jax
import jax.numpy as jnp
from jax.experimental import pallas as pl
from jax.experimental.pallas import tpu as pltpu

BN_EPS = 1e-5


def _round_up(n, m):
    return ((n + m - 1) // m) * m


def _vmem_capacity_bytes():
    try:
        return int(pltpu.get_tpu_info().vmem_capacity_bytes)
    except Exception:
        return 64 << 20          # conservative default (v7x per-TensorCore VMEM)


# ----------------------------------------------------------------------------- kernel
def dnn2l_kernel(x_ref, w1_ref, b1_ref, w2_ref, b2_ref, o_ref, acc_ref):
    """relu(x @ w1 + b1) @ w2' + b2'  (eval BN folded into w2'/b2'; dropout = identity)."""
    k = pl.program_id(1)                               # contraction (D) grid position

    @pl.when(k == 0)
    def _():
        acc_ref[...] = jnp.zeros_like(acc_ref)

    # fc1 partial product for this K slab (bf16 MXU, f32 accumulation).
    acc_ref[...] += jnp.dot(x_ref[...], w1_ref[...],
                            preferred_element_type=jnp.float32)

    @pl.when(k == pl.num_programs(1) - 1)
    def _():
        h = jnp.maximum(acc_ref[...] + b1_ref[...], 0.0)          # f32 epilogue
        y = jnp.dot(h.astype(w2_ref.dtype), w2_ref[...],
                    preferred_element_type=jnp.float32) + b2_ref[...]
        o_ref[...] = y.astype(o_ref.dtype)


# ---------------------------------------------------------------------------- wrapper
def prepare_kernel_params(params, compute_dtype=jnp.bfloat16):
    """Fold eval-mode BatchNorm into fc2, zero-pad dims to multiples of 128, and pick
    the fc1 contraction slab size (TK) from the per-generation VMEM budget."""
    cdt = jnp.dtype(compute_dtype)
    w1_t, b1 = params["w1_t"], params["b1"]            # (D, H), (1, H)
    w2_t, b2 = params["w2_t"], params["b2"]            # (H, O), (1, O)
    gamma, beta = params["bn_gamma"], params["bn_beta"]
    mean, var = params["bn_mean"], params["bn_var"]

    D, H = w1_t.shape
    O = w2_t.shape[1]

    # BN folding (eval mode, done in f32): BN(r) = scale*r + shift, applied post-ReLU,
    # so  w2' = diag(scale) @ w2_t   and   b2' = shift @ w2_t + b2.
    scale = gamma * jax.lax.rsqrt(var + BN_EPS)        # (1, H)
    shift = beta - mean * scale                        # (1, H)
    w2_f = scale.reshape(H, 1) * w2_t                  # (H, O)
    b2_f = shift @ w2_t + b2                           # (1, O)

    H_pad = _round_up(H, 128)
    O_pad = _round_up(O, 128)
    D_pad = _round_up(D, 128)

    itemsize = cdt.itemsize
    vmem_cap = _vmem_capacity_bytes()
    # Keep w1 fully VMEM-resident when small vs. the VMEM budget; otherwise stream it
    # over a trailing reduction grid axis in 1024-wide K slabs.
    if D_pad <= 1024 or D_pad * H_pad * itemsize <= vmem_cap // 4:
        TK = D_pad
    else:
        TK = 1024
        D_pad = _round_up(D, TK)

    # Fused pad+cast (single op per operand); biases stay f32 for the f32 epilogue.
    w1_p = jnp.zeros((D_pad, H_pad), cdt).at[:D, :H].set(w1_t.astype(cdt))
    b1_p = jnp.zeros((1, H_pad), jnp.float32).at[:, :H].set(b1)
    w2_p = jnp.zeros((H_pad, O_pad), cdt).at[:H, :O].set(w2_f.astype(cdt))
    b2_p = jnp.zeros((1, O_pad), jnp.float32).at[:, :O].set(b2_f)

    return {
        "w1": w1_p, "b1": b1_p, "w2": w2_p, "b2": b2_p,
        "tk": TK, "vmem_cap": vmem_cap,
        "in_size": D, "out_size": O, "compute_dtype": cdt,
    }


def dnn_2l_forward(x, kp):
    """x: (B, input_size) float32; kp: output of prepare_kernel_params."""
    B, D = x.shape
    assert D == kp["in_size"]
    D_pad, H_pad = kp["w1"].shape
    O_pad = kp["w2"].shape[1]
    O = kp["out_size"]
    TK = kp["tk"]
    n_k = D_pad // TK
    cdt = kp["compute_dtype"]
    itemsize = jnp.dtype(cdt).itemsize
    vmem_cap = kp["vmem_cap"]

    # bf16 writeback when O is padded far past its true size (e.g. O=1 -> O_pad=128):
    # values come from the f32 accumulator, so rounding loss is negligible, and the
    # inflated HBM store traffic is halved (matters most on v5e).
    out_dtype = jnp.bfloat16 if (itemsize == 2 and 4 * O <= O_pad) else jnp.float32
    out_itemsize = jnp.dtype(out_dtype).itemsize

    # Batch-axis sublane alignment: 16 rows for 2-byte tiles, 8 for f32.
    align = 16 if min(itemsize, out_itemsize) == 2 else 8

    # ---- derive the batch tile TB from the per-generation VMEM budget ------------
    headroom = 8 << 20
    w1_bufs = 1 if n_k == 1 else 2               # resident (single-buffered) vs streamed
    fixed_bytes = (w1_bufs * TK * H_pad * itemsize          # w1 buffer(s)
                   + H_pad * 4 + O_pad * 4                  # b1, b2 (f32, single-buffered)
                   + H_pad * O_pad * itemsize)              # w2 (single-buffered)
    per_row_bytes = (2 * TK * itemsize                      # x, double-buffered
                     + 2 * O_pad * out_itemsize             # out, double-buffered
                     + H_pad * 4)                           # f32 accumulator scratch
    tb_budget = (vmem_cap - headroom - fixed_bytes) // per_row_bytes
    tb_budget = max(align, (tb_budget // align) * align)
    # Keep >=2 batch-grid steps for medium batches so v7x megacore has work to shard.
    tb_cap = 256 if B <= 512 else 512
    TB = int(max(align, min(tb_cap, tb_budget, _round_up(B, align))))
    B_pad = _round_up(B, TB)
    n_b = B_pad // TB
    grid = (n_b, n_k)

    # ---- pad/cast x in one fused op; skip entirely when already aligned ----------
    if B_pad == B and D_pad == D:
        x_p = x if x.dtype == cdt else x.astype(cdt)
    else:
        x_p = jnp.zeros((B_pad, D_pad), cdt).at[:B, :D].set(x.astype(cdt))

    flops = 2 * B_pad * (D_pad * H_pad + H_pad * O_pad)
    bytes_accessed = (B_pad * D_pad * itemsize
                      + D_pad * H_pad * itemsize * (n_b if n_k > 1 else 1)
                      + H_pad * O_pad * itemsize
                      + 4 * (H_pad + O_pad)
                      + B_pad * O_pad * out_itemsize)
    needed = fixed_bytes + TB * per_row_bytes
    vmem_limit = int(max(32 << 20, min(vmem_cap - headroom, needed + (4 << 20))))

    def run(single_buffer_resident):
        res_mode = pl.Buffered(1) if single_buffer_resident else None
        w1_mode = res_mode if n_k == 1 else None           # streamed w1 stays 2-deep

        def spec(shape, idx, mode=None):
            if mode is None:
                return pl.BlockSpec(shape, idx)
            return pl.BlockSpec(shape, idx, pipeline_mode=mode)

        in_specs = [
            spec((TB, TK), lambda i, k: (i, k)),                  # x tile (streamed)
            spec((TK, H_pad), lambda i, k: (k, 0), w1_mode),      # w1
            spec((1, H_pad), lambda i, k: (0, 0), res_mode),      # b1 (resident)
            spec((H_pad, O_pad), lambda i, k: (0, 0), res_mode),  # w2 (resident, BN-folded)
            spec((1, O_pad), lambda i, k: (0, 0), res_mode),      # b2 (resident, BN-folded)
        ]
        out_specs = pl.BlockSpec((TB, O_pad), lambda i, k: (i, 0))  # lane-dense output

        return pl.pallas_call(
            dnn2l_kernel,
            out_shape=jax.ShapeDtypeStruct((B_pad, O_pad), out_dtype),
            grid_spec=pltpu.PrefetchScalarGridSpec(
                num_scalar_prefetch=0,
                grid=grid,
                in_specs=in_specs,
                out_specs=out_specs,
                scratch_shapes=[pltpu.VMEM((TB, H_pad), jnp.float32)],
            ),
            compiler_params=pltpu.CompilerParams(
                dimension_semantics=("parallel", "arbitrary"),
                vmem_limit_bytes=vmem_limit,
            ),
            cost_estimate=pl.CostEstimate(
                flops=int(flops), transcendentals=0,
                bytes_accessed=int(bytes_accessed)),
        )(x_p, kp["w1"], kp["b1"], kp["w2"], kp["b2"])

    try:
        out_pad = run(True)
    except Exception:
        # pl.Buffered(1) unsupported on this jax build: fall back to default buffering.
        out_pad = run(False)

    out = out_pad[:B, :O]
    return out.astype(jnp.float32) if out.dtype != jnp.float32 else out


# ------------------------------------------------------------------------ param init
def xavier_uniform(key, fan_out, fan_in):
    # matches torch.nn.init.xavier_uniform_ for a (fan_out, fan_in) Linear weight
    bound = math.sqrt(6.0 / (fan_in + fan_out))
    return jax.random.uniform(key, (fan_out, fan_in), jnp.float32, -bound, bound)


def init_params(key, input_size, n_l1, output_size=1):
    k1, k2, k3, k4 = jax.random.split(key, 4)
    # fc1 Linear(input_size -> n_l1)
    w1 = xavier_uniform(k1, n_l1, input_size)                 # (H, D) torch layout
    b1_bound = 1.0 / math.sqrt(input_size)                    # torch default bias init
    b1 = jax.random.uniform(k2, (1, n_l1), jnp.float32, -b1_bound, b1_bound)
    # fc2 Linear(n_l1 -> output_size)
    w2 = xavier_uniform(k3, output_size, n_l1)                # (O, H) torch layout
    b2_bound = 1.0 / math.sqrt(n_l1)
    b2 = jax.random.uniform(k4, (1, output_size), jnp.float32, -b2_bound, b2_bound)
    # BatchNorm1d(n_l1): weight=1, bias=0, running_mean=0, running_var=1
    return {
        "w1_t": jnp.asarray(w1.T),                            # (D, H)
        "b1": b1,                                             # (1, H)
        "bn_gamma": jnp.ones((1, n_l1), jnp.float32),
        "bn_beta": jnp.zeros((1, n_l1), jnp.float32),
        "bn_mean": jnp.zeros((1, n_l1), jnp.float32),
        "bn_var": jnp.ones((1, n_l1), jnp.float32),
        "w2_t": jnp.asarray(w2.T),                            # (H, O)
        "b2": b2,                                             # (1, O)
    }


if __name__ == "__main__":
    B, D, H, O = 8, 32, 32, 1
    key = jax.random.PRNGKey(0)
    kx, kp_key = jax.random.split(key)
    x = jax.random.normal(kx, (B, D), jnp.float32)
    params = init_params(kp_key, D, H, O)
    kparams = prepare_kernel_params(params)                   # bf16 compute by default

    out = dnn_2l_forward(x, kparams)
    out = jax.block_until_ready(out)
    assert out.shape == (B, O)

    # pure-JAX f32 reference (unfolded BN, unpadded) -- loose check for bf16 compute
    h = jnp.maximum(x @ params["w1_t"] + params["b1"], 0.0)
    h = params["bn_gamma"] * (h - params["bn_mean"]) * jax.lax.rsqrt(
        params["bn_var"] + BN_EPS) + params["bn_beta"]
    ref_f32 = h @ params["w2_t"] + params["b2"]
    assert jnp.allclose(out, ref_f32, atol=5e-2, rtol=5e-2), \
        float(jnp.max(jnp.abs(out - ref_f32)))

    # matching-precision reference (same bf16 casts / f32 accumulation / BN fold)
    cdt = kparams["compute_dtype"]
    scale = params["bn_gamma"] * jax.lax.rsqrt(params["bn_var"] + BN_EPS)
    shift = params["bn_beta"] - params["bn_mean"] * scale
    w2_f = scale.reshape(-1, 1) * params["w2_t"]
    b2_f = shift @ params["w2_t"] + params["b2"]
    hm = jnp.maximum(jnp.dot(x.astype(cdt), params["w1_t"].astype(cdt),
                             preferred_element_type=jnp.float32) + params["b1"], 0.0)
    ref_m = jnp.dot(hm.astype(cdt), w2_f.astype(cdt),
                    preferred_element_type=jnp.float32) + b2_f
    assert jnp.allclose(out, ref_m, atol=2e-2, rtol=2e-2), \
        float(jnp.max(jnp.abs(out - ref_m)))

    print("KERNEL_OK")
</pallas_src>

<mosaic_0001>
module attributes {stable_mosaic.version = 11 : i64} {
  func.func @dnn2l_kernel(%arg0: i32, %arg1: i32, %arg2: memref<16x128xbf16, #tpu.memory_space<vmem>>, %arg3: memref<128x128xbf16, #tpu.memory_space<vmem>>, %arg4: memref<1x128xf32, #tpu.memory_space<vmem>>, %arg5: memref<128x128xbf16, #tpu.memory_space<vmem>>, %arg6: memref<1x128xf32, #tpu.memory_space<vmem>>, %arg7: memref<16x128xbf16, #tpu.memory_space<vmem>>, %arg8: memref<16x128xf32, #tpu.memory_space<vmem>>) attributes {dimension_semantics = [#tpu.dimension_semantics<parallel>, #tpu.dimension_semantics<arbitrary>], iteration_bounds = array<i64: 1, 1>, scalar_prefetch = 0 : i64, scratch_operands = 1 : i64, tpu.core_type = #tpu.core_type<tc>, window_params = [{transform_indices = @transform_0, window_bounds = array<i64: 16, 128>}, {pipeline_mode = #tpu.pipeline_mode<synchronous>, transform_indices = @transform_1, window_bounds = array<i64: 128, 128>}, {pipeline_mode = #tpu.pipeline_mode<synchronous>, transform_indices = @transform_2, window_bounds = array<i64: 1, 128>}, {pipeline_mode = #tpu.pipeline_mode<synchronous>, transform_indices = @transform_3, window_bounds = array<i64: 128, 128>}, {pipeline_mode = #tpu.pipeline_mode<synchronous>, transform_indices = @transform_4, window_bounds = array<i64: 1, 128>}, {transform_indices = @transform_5, window_bounds = array<i64: 16, 128>}]} {
    %c0_i32 = arith.constant 0 : i32
    %0 = arith.cmpi eq, %arg1, %c0_i32 : i32
    %1 = arith.extui %0 : i1 to i32
    %c0_i32_0 = arith.constant 0 : i32
    %2 = arith.cmpi ne, %1, %c0_i32_0 : i32
    scf.if %2 {
      %cst_10 = arith.constant 0.000000e+00 : f32
      %12 = vector.broadcast %cst_10 : f32 to vector<16x128xf32>
      %c0_11 = arith.constant 0 : index
      %c0_12 = arith.constant 0 : index
      %13 = vector.load %arg8[%c0_11, %c0_12] : memref<16x128xf32, #tpu.memory_space<vmem>>, vector<16x128xf32>
      tpu.vector_store %arg8[%c0_11, %c0_12], %12 {strides = array<i32>} : memref<16x128xf32, #tpu.memory_space<vmem>>, vector<16x128xf32>,
    } else {
    }
    %c0 = arith.constant 0 : index
    %c0_1 = arith.constant 0 : index
    %3 = vector.load %arg8[%c0, %c0_1] : memref<16x128xf32, #tpu.memory_space<vmem>>, vector<16x128xf32>
    %c0_2 = arith.constant 0 : index
    %c0_3 = arith.constant 0 : index
    %4 = vector.load %arg2[%c0_2, %c0_3] : memref<16x128xbf16, #tpu.memory_space<vmem>>, vector<16x128xbf16>
    %c0_4 = arith.constant 0 : index
    %c0_5 = arith.constant 0 : index
    %5 = vector.load %arg3[%c0_4, %c0_5] : memref<128x128xbf16, #tpu.memory_space<vmem>>, vector<128x128xbf16>
    %cst = arith.constant dense<0.000000e+00> : vector<16x128xf32>
    %6 = tpu.matmul %4, %5, %cst {dimension_numbers = #tpu.dot_dimension_numbers<[1], [0], [0], [1], [0, 0, 1, 1], [], []>} : vector<16x128xbf16>, vector<128x128xbf16>, vector<16x128xf32> -> vector<16x128xf32>
    %7 = arith.addf %3, %6 : vector<16x128xf32>
    %c0_6 = arith.constant 0 : index
    %c0_7 = arith.constant 0 : index
    %8 = vector.load %arg8[%c0_6, %c0_7] : memref<16x128xf32, #tpu.memory_space<vmem>>, vector<16x128xf32>
    tpu.vector_store %arg8[%c0_6, %c0_7], %7 {strides = array<i32>} : memref<16x128xf32, #tpu.memory_space<vmem>>, vector<16x128xf32>,
    %c0_i32_8 = arith.constant 0 : i32
    %9 = arith.cmpi eq, %arg1, %c0_i32_8 : i32
    %10 = arith.extui %9 : i1 to i32
    %c0_i32_9 = arith.constant 0 : i32
    %11 = arith.cmpi ne, %10, %c0_i32_9 : i32
    scf.if %11 {
      %c0_10 = arith.constant 0 : index
      %c0_11 = arith.constant 0 : index
      %12 = vector.load %arg8[%c0_10, %c0_11] : memref<16x128xf32, #tpu.memory_space<vmem>>, vector<16x128xf32>
      %c0_12 = arith.constant 0 : index
      %c0_13 = arith.constant 0 : index
      %13 = vector.load %arg4[%c0_12, %c0_13] : memref<1x128xf32, #tpu.memory_space<vmem>>, vector<1x128xf32>
      %14 = vector.broadcast %13 : vector<1x128xf32> to vector<16x128xf32>
      %15 = arith.addf %12, %14 : vector<16x128xf32>
      %cst_14 = arith.constant 0.000000e+00 : f32
      %16 = vector.broadcast %cst_14 : f32 to vector<16x128xf32>
      %17 = arith.maximumf %15, %16 : vector<16x128xf32>
      %18 = arith.truncf %17 : vector<16x128xf32> to vector<16x128xbf16>
      %c0_15 = arith.constant 0 : index
      %c0_16 = arith.constant 0 : index
      %19 = vector.load %arg5[%c0_15, %c0_16] : memref<128x128xbf16, #tpu.memory_space<vmem>>, vector<128x128xbf16>
      %cst_17 = arith.constant dense<0.000000e+00> : vector<16x128xf32>
      %20 = tpu.matmul %18, %19, %cst_17 {dimension_numbers = #tpu.dot_dimension_numbers<[1], [0], [0], [1], [0, 0, 1, 1], [], []>} : vector<16x128xbf16>, vector<128x128xbf16>, vector<16x128xf32> -> vector<16x128xf32>
      %c0_18 = arith.constant 0 : index
      %c0_19 = arith.constant 0 : index
      %21 = vector.load %arg6[%c0_18, %c0_19] : memref<1x128xf32, #tpu.memory_space<vmem>>, vector<1x128xf32>
      %22 = vector.broadcast %21 : vector<1x128xf32> to vector<16x128xf32>
      %23 = arith.addf %20, %22 : vector<16x128xf32>
      %24 = arith.truncf %23 : vector<16x128xf32> to vector<16x128xbf16>
      %c0_20 = arith.constant 0 : index
      %c0_21 = arith.constant 0 : index
      %25 = vector.load %arg7[%c0_20, %c0_21] : memref<16x128xbf16, #tpu.memory_space<vmem>>, vector<16x128xbf16>
      tpu.vector_store %arg7[%c0_20, %c0_21], %24 {strides = array<i32>} : memref<16x128xbf16, #tpu.memory_space<vmem>>, vector<16x128xbf16>,
    } else {
    }
    return
  }
  func.func @transform_0(%arg0: i32, %arg1: i32) -> (i32, i32) {
    %c0_i32 = arith.constant 0 : i32
    return %arg0, %arg1 : i32, i32
  }
  func.func @transform_1(%arg0: i32, %arg1: i32) -> (i32, i32) {
    %c0_i32 = arith.constant 0 : i32
    %c0_i32_0 = arith.constant 0 : i32
    return %arg1, %c0_i32 : i32, i32
  }
  func.func @transform_2(%arg0: i32, %arg1: i32) -> (i32, i32) {
    %c0_i32 = arith.constant 0 : i32
    %c0_i32_0 = arith.constant 0 : i32
    %c0_i32_1 = arith.constant 0 : i32
    return %c0_i32, %c0_i32_0 : i32, i32
  }
  func.func @transform_3(%arg0: i32, %arg1: i32) -> (i32, i32) {
    %c0_i32 = arith.constant 0 : i32
    %c0_i32_0 = arith.constant 0 : i32
    %c0_i32_1 = arith.constant 0 : i32
    return %c0_i32, %c0_i32_0 : i32, i32
  }
  func.func @transform_4(%arg0: i32, %arg1: i32) -> (i32, i32) {
    %c0_i32 = arith.constant 0 : i32
    %c0_i32_0 = arith.constant 0 : i32
    %c0_i32_1 = arith.constant 0 : i32
    return %c0_i32, %c0_i32_0 : i32, i32
  }
  func.func @transform_5(%arg0: i32, %arg1: i32) -> (i32, i32) {
    %c0_i32 = arith.constant 0 : i32
    %c0_i32_0 = arith.constant 0 : i32
    return %arg0, %c0_i32 : i32, i32
  }
}

module attributes {stable_mosaic.version = 11 : i64} {
  func.func @dnn2l_kernel(%arg0: i32, %arg1: i32, %arg2: memref<16x128xbf16, #tpu.memory_space<vmem>>, %arg3: memref<128x128xbf16, #tpu.memory_space<vmem>>, %arg4: memref<1x128xf32, #tpu.memory_space<vmem>>, %arg5: memref<128x128xbf16, #tpu.memory_space<vmem>>, %arg6: memref<1x128xf32, #tpu.memory_space<vmem>>, %arg7: memref<16x128xbf16, #tpu.memory_space<vmem>>, %arg8: memref<16x128xf32, #tpu.memory_space<vmem>>) attributes {dimension_semantics = [#tpu.dimension_semantics<parallel>, #tpu.dimension_semantics<arbitrary>], iteration_bounds = array<i64: 1, 1>, scalar_prefetch = 0 : i64, scratch_operands = 1 : i64, tpu.core_type = #tpu.core_type<tc>, window_params = [{transform_indices = @transform_0, window_bounds = array<i64: 16, 128>}, {transform_indices = @transform_1, window_bounds = array<i64: 128, 128>}, {pipeline_mode = #tpu.pipeline_mode<synchronous>, transform_indices = @transform_2, window_bounds = array<i64: 1, 128>}, {pipeline_mode = #tpu.pipeline_mode<synchronous>, transform_indices = @transform_3, window_bounds = array<i64: 128, 128>}, {pipeline_mode = #tpu.pipeline_mode<synchronous>, transform_indices = @transform_4, window_bounds = array<i64: 1, 128>}, {transform_indices = @transform_5, window_bounds = array<i64: 16, 128>}]} {
    %c0_i32 = arith.constant 0 : i32
    %0 = arith.cmpi eq, %arg1, %c0_i32 : i32
    %1 = arith.extui %0 : i1 to i32
    %c0_i32_0 = arith.constant 0 : i32
    %2 = arith.cmpi ne, %1, %c0_i32_0 : i32
    scf.if %2 {
      %cst_10 = arith.constant 0.000000e+00 : f32
      %12 = vector.broadcast %cst_10 : f32 to vector<16x128xf32>
      %c0_11 = arith.constant 0 : index
      %c0_12 = arith.constant 0 : index
      %13 = vector.load %arg8[%c0_11, %c0_12] : memref<16x128xf32, #tpu.memory_space<vmem>>, vector<16x128xf32>
      tpu.vector_store %arg8[%c0_11, %c0_12], %12 {strides = array<i32>} : memref<16x128xf32, #tpu.memory_space<vmem>>, vector<16x128xf32>,
    } else {
    }
    %c0 = arith.constant 0 : index
    %c0_1 = arith.constant 0 : index
    %3 = vector.load %arg8[%c0, %c0_1] : memref<16x128xf32, #tpu.memory_space<vmem>>, vector<16x128xf32>
    %c0_2 = arith.constant 0 : index
    %c0_3 = arith.constant 0 : index
    %4 = vector.load %arg2[%c0_2, %c0_3] : memref<16x128xbf16, #tpu.memory_space<vmem>>, vector<16x128xbf16>
    %c0_4 = arith.constant 0 : index
    %c0_5 = arith.constant 0 : index
    %5 = vector.load %arg3[%c0_4, %c0_5] : memref<128x128xbf16, #tpu.memory_space<vmem>>, vector<128x128xbf16>
    %cst = arith.constant dense<0.000000e+00> : vector<16x128xf32>
    %6 = tpu.matmul %4, %5, %cst {dimension_numbers = #tpu.dot_dimension_numbers<[1], [0], [0], [1], [0, 0, 1, 1], [], []>} : vector<16x128xbf16>, vector<128x128xbf16>, vector<16x128xf32> -> vector<16x128xf32>
    %7 = arith.addf %3, %6 : vector<16x128xf32>
    %c0_6 = arith.constant 0 : index
    %c0_7 = arith.constant 0 : index
    %8 = vector.load %arg8[%c0_6, %c0_7] : memref<16x128xf32, #tpu.memory_space<vmem>>, vector<16x128xf32>
    tpu.vector_store %arg8[%c0_6, %c0_7], %7 {strides = array<i32>} : memref<16x128xf32, #tpu.memory_space<vmem>>, vector<16x128xf32>,
    %c0_i32_8 = arith.constant 0 : i32
    %9 = arith.cmpi eq, %arg1, %c0_i32_8 : i32
    %10 = arith.extui %9 : i1 to i32
    %c0_i32_9 = arith.constant 0 : i32
    %11 = arith.cmpi ne, %10, %c0_i32_9 : i32
    scf.if %11 {
      %c0_10 = arith.constant 0 : index
      %c0_11 = arith.constant 0 : index
      %12 = vector.load %arg8[%c0_10, %c0_11] : memref<16x128xf32, #tpu.memory_space<vmem>>, vector<16x128xf32>
      %c0_12 = arith.constant 0 : index
      %c0_13 = arith.constant 0 : index
      %13 = vector.load %arg4[%c0_12, %c0_13] : memref<1x128xf32, #tpu.memory_space<vmem>>, vector<1x128xf32>
      %14 = vector.broadcast %13 : vector<1x128xf32> to vector<16x128xf32>
      %15 = arith.addf %12, %14 : vector<16x128xf32>
      %cst_14 = arith.constant 0.000000e+00 : f32
      %16 = vector.broadcast %cst_14 : f32 to vector<16x128xf32>
      %17 = arith.maximumf %15, %16 : vector<16x128xf32>
      %18 = arith.truncf %17 : vector<16x128xf32> to vector<16x128xbf16>
      %c0_15 = arith.constant 0 : index
      %c0_16 = arith.constant 0 : index
      %19 = vector.load %arg5[%c0_15, %c0_16] : memref<128x128xbf16, #tpu.memory_space<vmem>>, vector<128x128xbf16>
      %cst_17 = arith.constant dense<0.000000e+00> : vector<16x128xf32>
      %20 = tpu.matmul %18, %19, %cst_17 {dimension_numbers = #tpu.dot_dimension_numbers<[1], [0], [0], [1], [0, 0, 1, 1], [], []>} : vector<16x128xbf16>, vector<128x128xbf16>, vector<16x128xf32> -> vector<16x128xf32>
      %c0_18 = arith.constant 0 : index
      %c0_19 = arith.constant 0 : index
      %21 = vector.load %arg6[%c0_18, %c0_19] : memref<1x128xf32, #tpu.memory_space<vmem>>, vector<1x128xf32>
      %22 = vector.broadcast %21 : vector<1x128xf32> to vector<16x128xf32>
      %23 = arith.addf %20, %22 : vector<16x128xf32>
      %24 = arith.truncf %23 : vector<16x128xf32> to vector<16x128xbf16>
      %c0_20 = arith.constant 0 : index
      %c0_21 = arith.constant 0 : index
      %25 = vector.load %arg7[%c0_20, %c0_21] : memref<16x128xbf16, #tpu.memory_space<vmem>>, vector<16x128xbf16>
      tpu.vector_store %arg7[%c0_20, %c0_21], %24 {strides = array<i32>} : memref<16x128xbf16, #tpu.memory_space<vmem>>, vector<16x128xbf16>,
    } else {
    }
    return
  }
  func.func @transform_0(%arg0: i32, %arg1: i32) -> (i32, i32) {
    %c0_i32 = arith.constant 0 : i32
    return %arg0, %arg1 : i32, i32
  }
  func.func @transform_1(%arg0: i32, %arg1: i32) -> (i32, i32) {
    %c0_i32 = arith.constant 0 : i32
    %c0_i32_0 = arith.constant 0 : i32
    return %arg1, %c0_i32 : i32, i32
  }
  func.func @transform_2(%arg0: i32, %arg1: i32) -> (i32, i32) {
    %c0_i32 = arith.constant 0 : i32
    %c0_i32_0 = arith.constant 0 : i32
    %c0_i32_1 = arith.constant 0 : i32
    return %c0_i32, %c0_i32_0 : i32, i32
  }
  func.func @transform_3(%arg0: i32, %arg1: i32) -> (i32, i32) {
    %c0_i32 = arith.constant 0 : i32
    %c0_i32_0 = arith.constant 0 : i32
    %c0_i32_1 = arith.constant 0 : i32
    return %c0_i32, %c0_i32_0 : i32, i32
  }
  func.func @transform_4(%arg0: i32, %arg1: i32) -> (i32, i32) {
    %c0_i32 = arith.constant 0 : i32
    %c0_i32_0 = arith.constant 0 : i32
    %c0_i32_1 = arith.constant 0 : i32
    return %c0_i32, %c0_i32_0 : i32, i32
  }
  func.func @transform_5(%arg0: i32, %arg1: i32) -> (i32, i32) {
    %c0_i32 = arith.constant 0 : i32
    %c0_i32_0 = arith.constant 0 : i32
    return %arg0, %c0_i32 : i32, i32
  }
}

</mosaic_0001>

<bundles_post_ra>
// kernel: tpu_custom_call.1
= control target key start
LH: loop header
LB: loop body
LE: loop exit
PB: predicated region body
PF: predicated region fallthrough
CT: control target
= control target key end

     0   :  { %10 = vsyncpa [#allocation4], 0  ;;  %s661_s0 = inlined_call_operand.hbm [shape: bf16[16,128], index: 0, kind: input, shape index: {}]   ;;  %s662_s1 = inlined_call_operand.hbm [shape: bf16[128,128], index: 1, kind: input, shape index: {}]   ;;  %s663_s2 = inlined_call_operand.vmem [shape: f32[1,128], index: 2, kind: input, shape index: {}]   ;;  %s664_s3 = inlined_call_operand.hbm [shape: bf16[128,128], index: 3, kind: input, shape index: {}]   ;;  %s665_s4 = inlined_call_operand.vmem [shape: f32[1,128], index: 4, kind: input, shape index: {}]   ;;  %s666_s5 = inlined_call_operand.hbm [shape: bf16[16,128], index: 5, kind: output, shape index: {}]  }
   0x1   :  { %11 = vsyncpa [#allocation7], 0 }
   0x2   :  { %12 = vsyncpa [#allocation5], 0  ;;  %s550_s18 = smov [#allocation6]   ;;  %s551_s20 = smov [#allocation3]  }
   0x3   :  { %s30_s19 = sshll.u32 %s550_s18, 4  ;;  %s18_s21 = sshll.u32 %s551_s20, 4  ;;  %s31_s19 = int_to_ptr.vmem [resolvable:$true] %s30_s19  ;;  %s588_s21 = int_to_ptr.vmem [resolvable:$true] %s18_s21 }
   0x4   :  { %s456_s24 = scalar_lea.hbm %s662_s1, 1024 }
   0x5   :  { %p457_p0 = scmp.ne.s32.totalorder %s662_s1, %s456_s24  ;;  %p460_p1 = scmp.lt.u32.totalorder %s456_s24, %s662_s1 }
   0x7   :  { %p462_p2 = pnand %p460_p1, %p457_p0 }
   0x9   :  { %465 = shalt.err (!%p462_p2)
}
   0xa   :  { %s466_s29 = scalar_lea.vmem %s31_s19, 1024  ;;  %p471_p4 = scmp.lt.s32.totalorder %s31_s19, %s31_s19 }
   0xb   :  { %p467_p3 = scmp.ne.s32.totalorder %s31_s19, %s466_s29  ;;  %p472_p5 = scmp.lt.s32.totalorder %s466_s29, %s466_s29 }
   0xd   :  { %p473_p6 = por %p472_p5, %p471_p4 }
   0xf   :  { %p474_p7 = pnand %p473_p6, %p467_p3 }
  0x11   :  { %477 = shalt.err (!%p474_p7)
}
  0x12   :  { %s552_s30 = smov 64   ;;  %s553_s6 = smov 4  }
  0x13   :  { %36 = dma.hbm_to_vmem [thread:$0]  %s662_s1, 1024, %s31_s19, [#allocation7], %s552_s30, %s552_s30, %s553_s6  }
  0x14   :  { %s478_s11 = scalar_lea.hbm %s661_s0, 128 }
  0x15   :  { %p479_p8 = scmp.ne.s32.totalorder %s661_s0, %s478_s11  ;;  %p482_p9 = scmp.lt.u32.totalorder %s478_s11, %s661_s0 }
  0x17   :  { %p484_p10 = pnand %p482_p9, %p479_p8 }
  0x19   :  { %487 = shalt.err (!%p484_p10)
}
  0x1a   :  { %s488_s16 = scalar_lea.vmem %s588_s21, 128  ;;  %p493_p12 = scmp.lt.s32.totalorder %s588_s21, %s588_s21 }
  0x1b   :  { %p489_p11 = scmp.ne.s32.totalorder %s588_s21, %s488_s16  ;;  %p494_p13 = scmp.lt.s32.totalorder %s488_s16, %s488_s16 }
  0x1d   :  { %p495_p0 = por %p494_p13, %p493_p12 }
  0x1f   :  { %p496_p1 = pnand %p495_p0, %p489_p11 }
  0x21   :  { %499 = shalt.err (!%p496_p1)
}
  0x22   :  { %24 = dma.hbm_to_vmem [thread:$0]  %s661_s0, 128, %s588_s21, [#allocation4], %s552_s30, %s552_s30, %s553_s6  }
  0x23   :  { %s554_s18 = smov [#allocation8]   ;;  %s500_s23 = scalar_lea.hbm %s664_s3, 1024 }
  0x24   :  { %s44_s19 = sshll.u32 %s554_s18, 4  ;;  %p501_p2 = scmp.ne.s32.totalorder %s664_s3, %s500_s23  ;;  %s45_s19 = int_to_ptr.vmem [resolvable:$true] %s44_s19 }
  0x25   :  { %p504_p3 = scmp.lt.u32.totalorder %s500_s23, %s664_s3 }
  0x27   :  { %p506_p4 = pnand %p504_p3, %p501_p2 }
  0x29   :  { %509 = shalt.err (!%p506_p4)
}
  0x2a   :  { %s510_s28 = scalar_lea.vmem %s45_s19, 1024  ;;  %p515_p6 = scmp.lt.s32.totalorder %s45_s19, %s45_s19 }
  0x2b   :  { %p511_p5 = scmp.ne.s32.totalorder %s45_s19, %s510_s28  ;;  %p516_p7 = scmp.lt.s32.totalorder %s510_s28, %s510_s28 }
  0x2d   :  { %p517_p8 = por %p516_p7, %p515_p6 }
  0x2f   :  { %p518_p9 = pnand %p517_p8, %p511_p5 }
  0x31   :  { %521 = shalt.err (!%p518_p9)
}
  0x32   :  { %50 = dma.hbm_to_vmem [thread:$0]  %s664_s3, 1024, %s45_s19, [#allocation7], %s552_s30, %s552_s30, %s553_s6  }
  0x33   :  { %544 = dma.done.wait [#allocation4], 128  }
  0x34   :  { %545 = vsyncadd [#allocation4], 4294967168 }
  0x35   :  { %546 = dma.done.wait [#allocation7], 2048  }
  0x36   :  { %547 = vsyncadd [#allocation7], 4294965248  ;;  %v555_v0 = vmov 0.0   ;;  %vm556_vm0 = vmmov 0   ;;  %v439_v1 = vld [vmem:[#allocation6] sm:$0xff]   ;;  %v440_v2 = vld [vmem:[#allocation6 + $0x8] sm:$0xff]  }
  0x37   :  { %391 = vmatprep.subr.bf16.mxu0 %v555_v0  ;;  %407 = vmatprep.mubr.msk.bf16.mxu0 %vm556_vm0, %v555_v0  ;;  %v441_v3 = vld [vmem:[#allocation6 + $0x10] sm:$0xff]   ;;  %v448_v4 = vld [vmem:[#allocation8] sm:$0xff]   ;;  %v442_v5 = vld [vmem:[#allocation6 + $0x18] sm:$0xff]   ;;  %s557_s9 = smov [#allocation9]  }
  0x38   :  { %411 = vmatprep.subr.bf16.mxu1 %v555_v0  ;;  %427 = vmatprep.mubr.msk.bf16.mxu1 %vm556_vm0, %v555_v0  ;;  %v449_v6 = vld [vmem:[#allocation8 + $0x8] sm:$0xff]   ;;  %v443_v7 = vld [vmem:[#allocation6 + $0x20] sm:$0xff]   ;;  %v450_v8 = vld [vmem:[#allocation8 + $0x10] sm:$0xff]   ;;  %s332_s10 = sshll.u32 %s557_s9, 4  ;;  %s333_s10 = int_to_ptr.vmem [resolvable:$true] %s332_s10 }
  0x39   :  { %392 = vmatpush3.bf16.msra.mxu0 %v439_v1  ;;  %412 = vmatpush3.bf16.msra.mxu1 %v448_v4  ;;  %v444_v9 = vld [vmem:[#allocation6 + $0x28] sm:$0xff]   ;;  %v451_v10 = vld [vmem:[#allocation8 + $0x18] sm:$0xff]   ;;  %v445_v11 = vld [vmem:[#allocation6 + $0x30] sm:$0xff]   ;;  %p527_p11 = scmp.lt.s32.totalorder %s333_s10, %s333_s10 }
  0x3a   :  { %393 = vmatprep.subr.bf16.mxu0 %v555_v0  ;;  %413 = vmatprep.subr.bf16.mxu1 %v555_v0  ;;  %v452_v12 = vld [vmem:[#allocation8 + $0x20] sm:$0xff]   ;;  %v446_v13 = vld [vmem:[#allocation6 + $0x38] sm:$0xff]   ;;  %v453_v14 = vld [vmem:[#allocation8 + $0x28] sm:$0xff]  }
  0x3b   :  { %v447_v15 = vld [vmem:[#allocation3] sm:$0xff]   ;;  %v454_v16 = vld [vmem:[#allocation8 + $0x30] sm:$0xff]  }
  0x3c   :  { %v455_v17 = vld [vmem:[#allocation8 + $0x38] sm:$0xff]  }
  0x3d   :  { %394 = vmatpush3.bf16.msra.mxu0 %v440_v2  ;;  %414 = vmatpush3.bf16.msra.mxu1 %v449_v6  ;;  %v354_v18 = vld [vmem:[%s663_s2] ss:$0 sm:$0xff]  ;;  %s522_s2 = scalar_lea.vmem %s333_s10, 128 }
  0x3e   :  { %395 = vmatprep.subr.bf16.mxu0 %v555_v0  ;;  %415 = vmatprep.subr.bf16.mxu1 %v555_v0  ;;  %v355_v28 = vld [vmem:[%s665_s4] ss:$0 sm:$0xff]  ;;  %p523_p10 = scmp.ne.s32.totalorder %s333_s10, %s522_s2  ;;  %p528_p12 = scmp.lt.s32.totalorder %s522_s2, %s522_s2 }
  0x40   :  { %p529_p13 = por %p528_p12, %p527_p11 }
  0x41   :  { %396 = vmatpush3.bf16.msra.mxu0 %v441_v3  ;;  %416 = vmatpush3.bf16.msra.mxu1 %v450_v8 }
  0x42   :  { %397 = vmatprep.subr.bf16.mxu0 %v555_v0  ;;  %417 = vmatprep.subr.bf16.mxu1 %v555_v0  ;;  %p530_p0 = pnand %p529_p13, %p523_p10 }
  0x45   :  { %398 = vmatpush3.bf16.msra.mxu0 %v442_v5  ;;  %418 = vmatpush3.bf16.msra.mxu1 %v451_v10 }
  0x46   :  { %399 = vmatprep.subr.bf16.mxu0 %v555_v0  ;;  %419 = vmatprep.subr.bf16.mxu1 %v555_v0 }
  0x49   :  { %400 = vmatpush3.bf16.msra.mxu0 %v443_v7  ;;  %420 = vmatpush3.bf16.msra.mxu1 %v452_v12 }
  0x4a   :  { %401 = vmatprep.subr.bf16.mxu0 %v555_v0  ;;  %421 = vmatprep.subr.bf16.mxu1 %v555_v0 }
  0x4d   :  { %402 = vmatpush3.bf16.msra.mxu0 %v444_v9  ;;  %422 = vmatpush3.bf16.msra.mxu1 %v453_v14 }
  0x4e   :  { %403 = vmatprep.subr.bf16.mxu0 %v555_v0  ;;  %423 = vmatprep.subr.bf16.mxu1 %v555_v0 }
  0x51   :  { %404 = vmatpush3.bf16.msra.mxu0 %v445_v11  ;;  %424 = vmatpush3.bf16.msra.mxu1 %v454_v16 }
  0x52   :  { %405 = vmatprep.subr.bf16.mxu0 %v555_v0  ;;  %425 = vmatprep.subr.bf16.mxu1 %v555_v0 }
  0x55   :  { %406 = vmatpush3.bf16.msra.mxu0 %v446_v13  ;;  %426 = vmatpush3.bf16.msra.mxu1 %v455_v17 }
  0x58   :  { %408 = vmatmul.mubr.bf16.vlgmr.msra.gmra.mrb[0].mxu0 %v447_v15 }
 0x12b   :  { %v177_v19 = vpop.f32.mrb[0].mxu0 }
 0x12c   :  { %v200_v20 = vadd.f32 %v354_v18, %v177_v19  ;;  %v409_v21 = vpop.f32.mrb[1].mxu0 }
 0x12d   :  { %v180_v22 = vpop.f32.mrb[2].mxu0 }
 0x12e   :  { %v201_v23 = vadd.f32 %v354_v18, %v180_v22  ;;  %v410_v24 = vpop.f32.mrb[3].mxu0  ;;  %v202_v25 = vmax.f32 %v200_v20, 0.0 }
 0x130   :  { %v203_v26 = vmax.f32 %v201_v23, 0.0 }
 0x132   :  { %v204_v27 = vpack.c.bf16 %v203_v26, %v202_v25 }
 0x134   :  { %428 = vmatmul.mubr.bf16.vlgmr.msra.gmra.mrb[0].mxu1 %v204_v27 }
 0x207   :  { %v310_v29 = vpop.f32.mrb[0].mxu1 }
 0x208   :  { %v429_v30 = vpop.f32.mrb[1].mxu1  ;;  %v311_v32 = vadd.f32 %v355_v28, %v310_v29 }
 0x209   :  { %v313_v31 = vpop.f32.mrb[2].mxu1 }
 0x20a   :  { %v314_v33 = vadd.f32 %v355_v28, %v313_v31  ;;  %v430_v34 = vpop.f32.mrb[3].mxu1 }
 0x20c   :  { %v371_v35 = vpack.c.bf16 %v314_v33, %v311_v32 }
 0x20e   :  { %372 = vst [vmem:[#allocation9] sm:$0xff] %v371_v35  }
 0x20f   :  { %533 = shalt.err (!%p530_p0)
}
 0x210   :  { %s534_s12 = scalar_lea.hbm %s666_s5, 128 }
 0x211   :  { %p535_p1 = scmp.ne.s32.totalorder %s666_s5, %s534_s12  ;;  %p538_p2 = scmp.lt.u32.totalorder %s534_s12, %s666_s5 }
 0x213   :  { %p540_p3 = pnand %p538_p2, %p535_p1 }
 0x215   :  { %543 = shalt.err (!%p540_p3)
}
 0x216   :  { %338 = dma.vmem_to_hbm [thread:$0]  %s333_s10, 128, %s666_s5, [#allocation5], %s552_s30, %s552_s30, %s553_s6  }
 0x217   :  { %548 = dma.done.wait [#allocation5], 128  }
 0x218   :  { %549 = vsyncadd [#allocation5], 4294967168 }
 0x219   :  { %342 = vsyncpa [#allocation4], 1 }
 0x21a   :  { %343 = vsyncpa [#allocation7], 1 }
 0x21b   :  { %344 = vsyncpa [#allocation5], 1 }

// kernel: tpu_custom_call.1
= control target key start
LH: loop header
LB: loop body
LE: loop exit
PB: predicated region body
PF: predicated region fallthrough
CT: control target
= control target key end

     0   :  { %10 = vsyncpa [#allocation4], 0  ;;  %s661_s0 = inlined_call_operand.hbm [shape: bf16[16,128], index: 0, kind: input, shape index: {}]   ;;  %s662_s1 = inlined_call_operand.hbm [shape: bf16[128,128], index: 1, kind: input, shape index: {}]   ;;  %s663_s2 = inlined_call_operand.vmem [shape: f32[1,128], index: 2, kind: input, shape index: {}]   ;;  %s664_s3 = inlined_call_operand.hbm [shape: bf16[128,128], index: 3, kind: input, shape index: {}]   ;;  %s665_s4 = inlined_call_operand.vmem [shape: f32[1,128], index: 4, kind: input, shape index: {}]   ;;  %s666_s5 = inlined_call_operand.hbm [shape: bf16[16,128], index: 5, kind: output, shape index: {}]  }
   0x1   :  { %11 = vsyncpa [#allocation7], 0 }
   0x2   :  { %12 = vsyncpa [#allocation5], 0  ;;  %s550_s18 = smov [#allocation6]   ;;  %s551_s20 = smov [#allocation3]  }
   0x3   :  { %s30_s19 = sshll.u32 %s550_s18, 4  ;;  %s18_s21 = sshll.u32 %s551_s20, 4  ;;  %s31_s19 = int_to_ptr.vmem [resolvable:$true] %s30_s19  ;;  %s588_s21 = int_to_ptr.vmem [resolvable:$true] %s18_s21 }
   0x4   :  { %s456_s24 = scalar_lea.hbm %s662_s1, 1024 }
   0x5   :  { %p457_p0 = scmp.ne.s32.totalorder %s662_s1, %s456_s24  ;;  %p460_p1 = scmp.lt.u32.totalorder %s456_s24, %s662_s1 }
   0x7   :  { %p462_p2 = pnand %p460_p1, %p457_p0 }
   0x9   :  { %465 = shalt.err (!%p462_p2)
}
   0xa   :  { %s466_s29 = scalar_lea.vmem %s31_s19, 1024  ;;  %p471_p4 = scmp.lt.s32.totalorder %s31_s19, %s31_s19 }
   0xb   :  { %p467_p3 = scmp.ne.s32.totalorder %s31_s19, %s466_s29  ;;  %p472_p5 = scmp.lt.s32.totalorder %s466_s29, %s466_s29 }
   0xd   :  { %p473_p6 = por %p472_p5, %p471_p4 }
   0xf   :  { %p474_p7 = pnand %p473_p6, %p467_p3 }
  0x11   :  { %477 = shalt.err (!%p474_p7)
}
  0x12   :  { %s552_s30 = smov 64   ;;  %s553_s6 = smov 4  }
  0x13   :  { %36 = dma.hbm_to_vmem [thread:$0]  %s662_s1, 1024, %s31_s19, [#allocation7], %s552_s30, %s552_s30, %s553_s6  }
  0x14   :  { %s478_s11 = scalar_lea.hbm %s661_s0, 128 }
  0x15   :  { %p479_p8 = scmp.ne.s32.totalorder %s661_s0, %s478_s11  ;;  %p482_p9 = scmp.lt.u32.totalorder %s478_s11, %s661_s0 }
  0x17   :  { %p484_p10 = pnand %p482_p9, %p479_p8 }
  0x19   :  { %487 = shalt.err (!%p484_p10)
}
  0x1a   :  { %s488_s16 = scalar_lea.vmem %s588_s21, 128  ;;  %p493_p12 = scmp.lt.s32.totalorder %s588_s21, %s588_s21 }
  0x1b   :  { %p489_p11 = scmp.ne.s32.totalorder %s588_s21, %s488_s16  ;;  %p494_p13 = scmp.lt.s32.totalorder %s488_s16, %s488_s16 }
  0x1d   :  { %p495_p0 = por %p494_p13, %p493_p12 }
  0x1f   :  { %p496_p1 = pnand %p495_p0, %p489_p11 }
  0x21   :  { %499 = shalt.err (!%p496_p1)
}
  0x22   :  { %24 = dma.hbm_to_vmem [thread:$0]  %s661_s0, 128, %s588_s21, [#allocation4], %s552_s30, %s552_s30, %s553_s6  }
  0x23   :  { %s554_s18 = smov [#allocation8]   ;;  %s500_s23 = scalar_lea.hbm %s664_s3, 1024 }
  0x24   :  { %s44_s19 = sshll.u32 %s554_s18, 4  ;;  %p501_p2 = scmp.ne.s32.totalorder %s664_s3, %s500_s23  ;;  %s45_s19 = int_to_ptr.vmem [resolvable:$true] %s44_s19 }
  0x25   :  { %p504_p3 = scmp.lt.u32.totalorder %s500_s23, %s664_s3 }
  0x27   :  { %p506_p4 = pnand %p504_p3, %p501_p2 }
  0x29   :  { %509 = shalt.err (!%p506_p4)
}
  0x2a   :  { %s510_s28 = scalar_lea.vmem %s45_s19, 1024  ;;  %p515_p6 = scmp.lt.s32.totalorder %s45_s19, %s45_s19 }
  0x2b   :  { %p511_p5 = scmp.ne.s32.totalorder %s45_s19, %s510_s28  ;;  %p516_p7 = scmp.lt.s32.totalorder %s510_s28, %s510_s28 }
  0x2d   :  { %p517_p8 = por %p516_p7, %p515_p6 }
  0x2f   :  { %p518_p9 = pnand %p517_p8, %p511_p5 }
  0x31   :  { %521 = shalt.err (!%p518_p9)
}
  0x32   :  { %50 = dma.hbm_to_vmem [thread:$0]  %s664_s3, 1024, %s45_s19, [#allocation7], %s552_s30, %s552_s30, %s553_s6  }
  0x33   :  { %544 = dma.done.wait [#allocation4], 128  }
  0x34   :  { %545 = vsyncadd [#allocation4], 4294967168 }
  0x35   :  { %546 = dma.done.wait [#allocation7], 2048  }
  0x36   :  { %547 = vsyncadd [#allocation7], 4294965248  ;;  %v555_v0 = vmov 0.0   ;;  %vm556_vm0 = vmmov 0   ;;  %v439_v1 = vld [vmem:[#allocation6] sm:$0xff]   ;;  %v440_v2 = vld [vmem:[#allocation6 + $0x8] sm:$0xff]  }
  0x37   :  { %391 = vmatprep.subr.bf16.mxu0 %v555_v0  ;;  %407 = vmatprep.mubr.msk.bf16.mxu0 %vm556_vm0, %v555_v0  ;;  %v441_v3 = vld [vmem:[#allocation6 + $0x10] sm:$0xff]   ;;  %v448_v4 = vld [vmem:[#allocation8] sm:$0xff]   ;;  %v442_v5 = vld [vmem:[#allocation6 + $0x18] sm:$0xff]   ;;  %s557_s9 = smov [#allocation9]  }
  0x38   :  { %411 = vmatprep.subr.bf16.mxu1 %v555_v0  ;;  %427 = vmatprep.mubr.msk.bf16.mxu1 %vm556_vm0, %v555_v0  ;;  %v449_v6 = vld [vmem:[#allocation8 + $0x8] sm:$0xff]   ;;  %v443_v7 = vld [vmem:[#allocation6 + $0x20] sm:$0xff]   ;;  %v450_v8 = vld [vmem:[#allocation8 + $0x10] sm:$0xff]   ;;  %s332_s10 = sshll.u32 %s557_s9, 4  ;;  %s333_s10 = int_to_ptr.vmem [resolvable:$true] %s332_s10 }
  0x39   :  { %392 = vmatpush3.bf16.msra.mxu0 %v439_v1  ;;  %412 = vmatpush3.bf16.msra.mxu1 %v448_v4  ;;  %v444_v9 = vld [vmem:[#allocation6 + $0x28] sm:$0xff]   ;;  %v451_v10 = vld [vmem:[#allocation8 + $0x18] sm:$0xff]   ;;  %v445_v11 = vld [vmem:[#allocation6 + $0x30] sm:$0xff]   ;;  %p527_p11 = scmp.lt.s32.totalorder %s333_s10, %s333_s10 }
  0x3a   :  { %393 = vmatprep.subr.bf16.mxu0 %v555_v0  ;;  %413 = vmatprep.subr.bf16.mxu1 %v555_v0  ;;  %v452_v12 = vld [vmem:[#allocation8 + $0x20] sm:$0xff]   ;;  %v446_v13 = vld [vmem:[#allocation6 + $0x38] sm:$0xff]   ;;  %v453_v14 = vld [vmem:[#allocation8 + $0x28] sm:$0xff]  }
  0x3b   :  { %v447_v15 = vld [vmem:[#allocation3] sm:$0xff]   ;;  %v454_v16 = vld [vmem:[#allocation8 + $0x30] sm:$0xff]  }
  0x3c   :  { %v455_v17 = vld [vmem:[#allocation8 + $0x38] sm:$0xff]  }
  0x3d   :  { %394 = vmatpush3.bf16.msra.mxu0 %v440_v2  ;;  %414 = vmatpush3.bf16.msra.mxu1 %v449_v6  ;;  %v354_v18 = vld [vmem:[%s663_s2] ss:$0 sm:$0xff]  ;;  %s522_s2 = scalar_lea.vmem %s333_s10, 128 }
  0x3e   :  { %395 = vmatprep.subr.bf16.mxu0 %v555_v0  ;;  %415 = vmatprep.subr.bf16.mxu1 %v555_v0  ;;  %v355_v28 = vld [vmem:[%s665_s4] ss:$0 sm:$0xff]  ;;  %p523_p10 = scmp.ne.s32.totalorder %s333_s10, %s522_s2  ;;  %p528_p12 = scmp.lt.s32.totalorder %s522_s2, %s522_s2 }
  0x40   :  { %p529_p13 = por %p528_p12, %p527_p11 }
  0x41   :  { %396 = vmatpush3.bf16.msra.mxu0 %v441_v3  ;;  %416 = vmatpush3.bf16.msra.mxu1 %v450_v8 }
  0x42   :  { %397 = vmatprep.subr.bf16.mxu0 %v555_v0  ;;  %417 = vmatprep.subr.bf16.mxu1 %v555_v0  ;;  %p530_p0 = pnand %p529_p13, %p523_p10 }
  0x45   :  { %398 = vmatpush3.bf16.msra.mxu0 %v442_v5  ;;  %418 = vmatpush3.bf16.msra.mxu1 %v451_v10 }
  0x46   :  { %399 = vmatprep.subr.bf16.mxu0 %v555_v0  ;;  %419 = vmatprep.subr.bf16.mxu1 %v555_v0 }
  0x49   :  { %400 = vmatpush3.bf16.msra.mxu0 %v443_v7  ;;  %420 = vmatpush3.bf16.msra.mxu1 %v452_v12 }
  0x4a   :  { %401 = vmatprep.subr.bf16.mxu0 %v555_v0  ;;  %421 = vmatprep.subr.bf16.mxu1 %v555_v0 }
  0x4d   :  { %402 = vmatpush3.bf16.msra.mxu0 %v444_v9  ;;  %422 = vmatpush3.bf16.msra.mxu1 %v453_v14 }
  0x4e   :  { %403 = vmatprep.subr.bf16.mxu0 %v555_v0  ;;  %423 = vmatprep.subr.bf16.mxu1 %v555_v0 }
  0x51   :  { %404 = vmatpush3.bf16.msra.mxu0 %v445_v11  ;;  %424 = vmatpush3.bf16.msra.mxu1 %v454_v16 }
  0x52   :  { %405 = vmatprep.subr.bf16.mxu0 %v555_v0  ;;  %425 = vmatprep.subr.bf16.mxu1 %v555_v0 }
  0x55   :  { %406 = vmatpush3.bf16.msra.mxu0 %v446_v13  ;;  %426 = vmatpush3.bf16.msra.mxu1 %v455_v17 }
  0x58   :  { %408 = vmatmul.mubr.bf16.vlgmr.msra.gmra.mrb[0].mxu0 %v447_v15 }
 0x12b   :  { %v177_v19 = vpop.f32.mrb[0].mxu0 }
 0x12c   :  { %v200_v20 = vadd.f32 %v354_v18, %v177_v19  ;;  %v409_v21 = vpop.f32.mrb[1].mxu0 }
 0x12d   :  { %v180_v22 = vpop.f32.mrb[2].mxu0 }
 0x12e   :  { %v201_v23 = vadd.f32 %v354_v18, %v180_v22  ;;  %v410_v24 = vpop.f32.mrb[3].mxu0  ;;  %v202_v25 = vmax.f32 %v200_v20, 0.0 }
 0x130   :  { %v203_v26 = vmax.f32 %v201_v23, 0.0 }
 0x132   :  { %v204_v27 = vpack.c.bf16 %v203_v26, %v202_v25 }
 0x134   :  { %428 = vmatmul.mubr.bf16.vlgmr.msra.gmra.mrb[0].mxu1 %v204_v27 }
 0x207   :  { %v310_v29 = vpop.f32.mrb[0].mxu1 }
 0x208   :  { %v429_v30 = vpop.f32.mrb[1].mxu1  ;;  %v311_v32 = vadd.f32 %v355_v28, %v310_v29 }
 0x209   :  { %v313_v31 = vpop.f32.mrb[2].mxu1 }
 0x20a   :  { %v314_v33 = vadd.f32 %v355_v28, %v313_v31  ;;  %v430_v34 = vpop.f32.mrb[3].mxu1 }
 0x20c   :  { %v371_v35 = vpack.c.bf16 %v314_v33, %v311_v32 }
 0x20e   :  { %372 = vst [vmem:[#allocation9] sm:$0xff] %v371_v35  }
 0x20f   :  { %533 = shalt.err (!%p530_p0)
}
 0x210   :  { %s534_s12 = scalar_lea.hbm %s666_s5, 128 }
 0x211   :  { %p535_p1 = scmp.ne.s32.totalorder %s666_s5, %s534_s12  ;;  %p538_p2 = scmp.lt.u32.totalorder %s534_s12, %s666_s5 }
 0x213   :  { %p540_p3 = pnand %p538_p2, %p535_p1 }
 0x215   :  { %543 = shalt.err (!%p540_p3)
}
 0x216   :  { %338 = dma.vmem_to_hbm [thread:$0]  %s333_s10, 128, %s666_s5, [#allocation5], %s552_s30, %s552_s30, %s553_s6  }
 0x217   :  { %548 = dma.done.wait [#allocation5], 128  }
 0x218   :  { %549 = vsyncadd [#allocation5], 4294967168 }
 0x219   :  { %342 = vsyncpa [#allocation4], 1 }
 0x21a   :  { %343 = vsyncpa [#allocation7], 1 }
 0x21b   :  { %344 = vsyncpa [#allocation5], 1 }

</bundles_post_ra>
